<compile_context>
chip_gen: v5e
topology: v5e:2x2
jax: 0.10.0
libtpu: 0.0.40
codegen_flags: <defaults>
</compile_context>

<pallas_src>
import jax
import jax.numpy as jnp
from jax.experimental import pallas as pl
from jax.experimental.pallas import tpu as pltpu

LANES = 128
MAX_BLOCK_ROWS = 8192          # (8192, 128) f32 tile = 4 MiB per input per buffer


def _make_rmse_kernel(block_rows, num_tiles, tail_rows):
    """Build a kernel specialized to static tile geometry.

    block_rows : rows per VMEM block (multiple of 8)
    num_tiles  : grid extent
    tail_rows  : valid rows in the last block (0 means the last block is full)
    """

    def _partial_sum(sq):
        # (block_rows, 128) -> (block_rows//8, 8, 128) is a layout-compatible
        # split of the sublane axis; sum over axis 0 is pure VALU vreg adds.
        return jnp.sum(sq.reshape(block_rows // 8, 8, LANES), axis=0)

    def kernel(p_ref, t_ref, out_ref, acc_ref):
        j = pl.program_id(0)

        @pl.when(j == 0)
        def _init():
            acc_ref[...] = jnp.zeros_like(acc_ref)

        # Cast to f32 in-kernel (matches torch.FloatTensor semantics; DMA stays
        # at native dtype width for low-precision inputs).
        d = p_ref[...].astype(jnp.float32) - t_ref[...].astype(jnp.float32)
        sq = d * d

        if tail_rows == 0:
            # Every block is full: single unmasked path.
            acc_ref[...] += _partial_sum(sq)
        else:
            @pl.when(j < num_tiles - 1)
            def _full_tile():
                acc_ref[...] += _partial_sum(sq)

            @pl.when(j == num_tiles - 1)
            def _tail_tile():
                # Rows past the valid region hold unspecified VMEM contents
                # (partial-block DMA); zero them before accumulation.
                row_ids = jax.lax.broadcasted_iota(
                    jnp.int32, (block_rows, 1), 0)
                msq = jnp.where(row_ids < tail_rows, sq, 0.0)
                acc_ref[...] += _partial_sum(msq)

        @pl.when(j == num_tiles - 1)
        def _epilogue():
            out_ref[0, 0] = jnp.sum(acc_ref[...])

    return kernel


def _sum_sq_diff_kernel(p2d, t2d, rows):
    """Sum of squared differences over a (rows, 128) pair, via Pallas."""
    # Shrink the block for small inputs; keep it a multiple of 8 sublanes.
    block_rows = min(MAX_BLOCK_ROWS, ((rows + 7) // 8) * 8)
    num_tiles = pl.cdiv(rows, block_rows)
    tail_rows = rows % block_rows          # 0 -> last block is full

    out = pl.pallas_call(
        _make_rmse_kernel(block_rows, num_tiles, tail_rows),
        out_shape=jax.ShapeDtypeStruct((1, 1), jnp.float32),
        grid_spec=pltpu.PrefetchScalarGridSpec(
            num_scalar_prefetch=0,
            grid=(num_tiles,),
            in_specs=[
                pl.BlockSpec((block_rows, LANES), lambda j: (j, 0)),
                pl.BlockSpec((block_rows, LANES), lambda j: (j, 0)),
            ],
            out_specs=pl.BlockSpec(
                (1, 1), lambda j: (0, 0), memory_space=pltpu.SMEM),
            scratch_shapes=[pltpu.VMEM((8, LANES), jnp.float32)],
        ),
        compiler_params=pltpu.CompilerParams(
            dimension_semantics=("arbitrary",),
            vmem_limit_bytes=32 * 1024 * 1024,
        ),
    )(p2d, t2d)
    return out[0, 0]


def rmse(y_pred, y_true):
    """RMSE over all elements. Returns a float32 scalar."""
    p = jnp.ravel(y_pred)
    t = jnp.ravel(y_true)
    n = p.shape[0]
    if n == 0:
        return jnp.float32(float("nan"))   # mean over empty -> NaN (torch parity)

    n_main = (n // LANES) * LANES          # lane-aligned prefix length (static)

    # Tail (< 128 elements): plain JAX, negligible cost, avoids any HBM pad copy.
    if n_main < n:
        tail_sq = jnp.sum(
            (p[n_main:].astype(jnp.float32) - t[n_main:].astype(jnp.float32)) ** 2)
    else:
        tail_sq = jnp.float32(0.0)

    if n_main == 0:
        total = tail_sq
    else:
        rows = n_main // LANES
        if n_main < n:
            pm, tm = p[:n_main], t[:n_main]
        else:
            pm, tm = p, t
        pm = pm.reshape(rows, LANES)       # free reshape: last dim -> 128 lanes
        tm = tm.reshape(rows, LANES)
        total = _sum_sq_diff_kernel(pm, tm, rows) + tail_sq

    return jnp.sqrt(total / jnp.float32(n))


if __name__ == "__main__":
    key = jax.random.PRNGKey(0)
    k1, k2 = jax.random.split(key)
    # Shapes consistent with a typical NCHW prediction/target pair.
    y_pred = jax.random.normal(k1, (2, 4, 16, 16), dtype=jnp.float32)
    y_true = jax.random.normal(k2, (2, 4, 16, 16), dtype=jnp.float32)

    out = jax.block_until_ready(rmse(y_pred, y_true))

    # Reference check in plain JAX.
    ref = jnp.sqrt(jnp.mean(
        (jnp.ravel(y_pred).astype(jnp.float32)
         - jnp.ravel(y_true).astype(jnp.float32)) ** 2))
    assert jnp.allclose(out, ref, rtol=1e-5, atol=1e-6), (out, ref)

    print("KERNEL_OK")
</pallas_src>

<mosaic_0001>
module attributes {stable_mosaic.version = 11 : i64} {
  func.func @kernel(%arg0: i32, %arg1: memref<16x128xf32, #tpu.memory_space<vmem>>, %arg2: memref<16x128xf32, #tpu.memory_space<vmem>>, %arg3: memref<1x1xf32, #tpu.memory_space<smem>>, %arg4: memref<8x128xf32, #tpu.memory_space<vmem>>) attributes {dimension_semantics = [#tpu.dimension_semantics<arbitrary>], iteration_bounds = array<i64: 1>, scalar_prefetch = 0 : i64, scratch_operands = 1 : i64, tpu.core_type = #tpu.core_type<tc>, window_params = [{transform_indices = @transform_0, window_bounds = array<i64: 16, 128>}, {transform_indices = @transform_1, window_bounds = array<i64: 16, 128>}, {transform_indices = @transform_2, window_bounds = array<i64: 1, 1>}]} {
    %c0_i32 = arith.constant 0 : i32
    %0 = arith.cmpi eq, %arg0, %c0_i32 : i32
    %1 = arith.extui %0 : i1 to i32
    %c0_i32_0 = arith.constant 0 : i32
    %2 = arith.cmpi ne, %1, %c0_i32_0 : i32
    scf.if %2 {
      %cst_10 = arith.constant 0.000000e+00 : f32
      %15 = vector.broadcast %cst_10 : f32 to vector<8x128xf32>
      %c0_11 = arith.constant 0 : index
      %c0_12 = arith.constant 0 : index
      %16 = vector.load %arg4[%c0_11, %c0_12] : memref<8x128xf32, #tpu.memory_space<vmem>>, vector<8x128xf32>
      tpu.vector_store %arg4[%c0_11, %c0_12], %15 {strides = array<i32>} : memref<8x128xf32, #tpu.memory_space<vmem>>, vector<8x128xf32>,
    } else {
    }
    %c0 = arith.constant 0 : index
    %c0_1 = arith.constant 0 : index
    %3 = vector.load %arg1[%c0, %c0_1] : memref<16x128xf32, #tpu.memory_space<vmem>>, vector<16x128xf32>
    %c0_2 = arith.constant 0 : index
    %c0_3 = arith.constant 0 : index
    %4 = vector.load %arg2[%c0_2, %c0_3] : memref<16x128xf32, #tpu.memory_space<vmem>>, vector<16x128xf32>
    %5 = arith.subf %3, %4 : vector<16x128xf32>
    %6 = arith.mulf %5, %5 : vector<16x128xf32>
    %c0_4 = arith.constant 0 : index
    %c0_5 = arith.constant 0 : index
    %7 = vector.load %arg4[%c0_4, %c0_5] : memref<8x128xf32, #tpu.memory_space<vmem>>, vector<8x128xf32>
    %8 = vector.shape_cast %6 : vector<16x128xf32> to vector<2x8x128xf32>
    %cst = arith.constant dense<0.000000e+00> : vector<8x128xf32>
    %9 = vector.multi_reduction <add>, %8, %cst [0] : vector<2x8x128xf32> to vector<8x128xf32>
    %10 = arith.addf %7, %9 : vector<8x128xf32>
    %c0_6 = arith.constant 0 : index
    %c0_7 = arith.constant 0 : index
    %11 = vector.load %arg4[%c0_6, %c0_7] : memref<8x128xf32, #tpu.memory_space<vmem>>, vector<8x128xf32>
    tpu.vector_store %arg4[%c0_6, %c0_7], %10 {strides = array<i32>} : memref<8x128xf32, #tpu.memory_space<vmem>>, vector<8x128xf32>,
    %c0_i32_8 = arith.constant 0 : i32
    %12 = arith.cmpi eq, %arg0, %c0_i32_8 : i32
    %13 = arith.extui %12 : i1 to i32
    %c0_i32_9 = arith.constant 0 : i32
    %14 = arith.cmpi ne, %13, %c0_i32_9 : i32
    scf.if %14 {
      %c0_10 = arith.constant 0 : index
      %c0_11 = arith.constant 0 : index
      %15 = vector.load %arg4[%c0_10, %c0_11] : memref<8x128xf32, #tpu.memory_space<vmem>>, vector<8x128xf32>
      %16 = vector.shape_cast %15 : vector<8x128xf32> to vector<1x8x128xf32>
      %cst_12 = arith.constant dense<0.000000e+00> : vector<1xf32>
      %17 = vector.multi_reduction <add>, %16, %cst_12 [1, 2] : vector<1x8x128xf32> to vector<1xf32>
      %18 = vector.shape_cast %17 : vector<1xf32> to vector<1x1x1xf32>
      %19 = vector.extract %18[0, 0, 0] : f32 from vector<1x1x1xf32>
      %c0_13 = arith.constant 0 : index
      %c0_14 = arith.constant 0 : index
      %20 = memref.load %arg3[%c0_13, %c0_14] : memref<1x1xf32, #tpu.memory_space<smem>>
      memref.store %19, %arg3[%c0_13, %c0_14] : memref<1x1xf32, #tpu.memory_space<smem>>
    } else {
    }
    return
  }
  func.func @transform_0(%arg0: i32) -> (i32, i32) {
    %c0_i32 = arith.constant 0 : i32
    %c0_i32_0 = arith.constant 0 : i32
    return %arg0, %c0_i32 : i32, i32
  }
  func.func @transform_1(%arg0: i32) -> (i32, i32) {
    %c0_i32 = arith.constant 0 : i32
    %c0_i32_0 = arith.constant 0 : i32
    return %arg0, %c0_i32 : i32, i32
  }
  func.func @transform_2(%arg0: i32) -> (i32, i32) {
    %c0_i32 = arith.constant 0 : i32
    %c0_i32_0 = arith.constant 0 : i32
    %c0_i32_1 = arith.constant 0 : i32
    return %c0_i32, %c0_i32_0 : i32, i32
  }
}

</mosaic_0001>

<bundles_post_ra>
// kernel: tpu_custom_call.1
= control target key start
LH: loop header
LB: loop body
LE: loop exit
PB: predicated region body
PF: predicated region fallthrough
CT: control target
= control target key end

     0   :  { %7 = vsyncpa [#allocation4], 0  ;;  %s195_s0 = inlined_call_operand.hbm [shape: f32[16,128], index: 0, kind: input, shape index: {}]   ;;  %s196_s1 = inlined_call_operand.hbm [shape: f32[16,128], index: 1, kind: input, shape index: {}]   ;;  %s197_s2 = inlined_call_operand.hbm [shape: f32[1,1], index: 2, kind: output, shape index: {}]  }
   0x1   :  { %8 = vsyncpa [#allocation7], 0 }
   0x2   :  { %9 = vsyncpa [#allocation5], 0  ;;  %s14_s11 = sshll.u32 %s195_s0, 4  ;;  %s166_s12 = smov [#allocation3]   ;;  %s15_s11 = int_to_ptr.hbm [resolvable:$true] %s14_s11 }
   0x3   :  { %s16_s13 = sshll.u32 %s166_s12, 4  ;;  %s27_s16 = sshll.u32 %s196_s1, 4  ;;  %s17_s13 = int_to_ptr.vmem [resolvable:$true] %s16_s13  ;;  %s28_s16 = int_to_ptr.hbm [resolvable:$true] %s27_s16 }
   0x4   :  { %s167_s17 = smov 128   ;;  %s168_s18 = smov 8  }
   0x5   :  { %22 = dma.hbm_to_vmem [thread:$0]  %s15_s11, 256, %s17_s13, [#allocation4], %s167_s17, %s167_s17, %s168_s18  }
   0x6   :  { %s169_s19 = smov [#allocation6]  }
   0x7   :  { %s29_s20 = sshll.u32 %s169_s19, 4  ;;  %s30_s20 = int_to_ptr.vmem [resolvable:$true] %s29_s20 }
   0x8   :  { %35 = dma.hbm_to_vmem [thread:$0]  %s28_s16, 256, %s30_s20, [#allocation7], %s167_s17, %s167_s17, %s168_s18  }
   0x9   :  { %160 = dma.done.wait [#allocation4], 256  }
   0xa   :  { %161 = vsyncadd [#allocation4], 4294967040 }
   0xb   :  { %162 = dma.done.wait [#allocation7], 256  }
   0xc   :  { %163 = vsyncadd [#allocation7], 4294967040  ;;  %v49_v0 = vld [vmem:[#allocation3] sm:$0xff]  ;;  %v50_v1 = vld [vmem:[#allocation3 + $0x8] sm:$0xff]  ;;  %s81_s21 = sshll.u32 %s197_s2, 4  ;;  %s170_s23 = smov [#allocation8]   ;;  %s82_s21 = int_to_ptr.hbm [resolvable:$true] %s81_s21 }
   0xd   :  { %v51_v2 = vld [vmem:[#allocation6] sm:$0xff]  ;;  %v52_v3 = vld [vmem:[#allocation6 + $0x8] sm:$0xff] }
   0xe   :  { %v53_v4 = vsub.f32 %v49_v0, %v51_v2  ;;  %v54_v5 = vsub.f32 %v50_v1, %v52_v3 }
  0x10   :  { %v55_v6 = vmul.f32 %v53_v4, %v53_v4  ;;  %v56_v7 = vmul.f32 %v54_v5, %v54_v5 }
  0x12   :  { %v58_v8 = vadd.f32 %v56_v7, %v55_v6 }
  0x14   :  { %65 = vadd.xlane.f32.xlu0 %v58_v8 }
  0x87   :  { %v66_v9 = vpop.xlane.xlu0 %65 }
  0x88   :  { %v67_v10 = vrot.slane %v66_v9, 4 }
  0x8a   :  { %v68_v11 = vadd.f32 %v67_v10, %v66_v9 }
  0x8c   :  { %v69_v12 = vrot.slane %v68_v11, 2 }
  0x8e   :  { %v70_v13 = vadd.f32 %v69_v12, %v68_v11 }
  0x90   :  { %v71_v14 = vrot.slane %v70_v13, 1 }
  0x92   :  { %v72_v15 = vadd.f32 %v71_v14, %v70_v13 }
  0x94   :  { %93 = vpush %v72_v15 }
  0xc5   :  { %s94_s22 = spop %93 }
  0xc6   :  { %75 = sst [smem:[#allocation8]] %s94_s22 }
  0xc7   :  { %84 = dma.smem_to_hbm %s170_s23, 16, %s82_s21, [#allocation5]  }
  0xc8   :  { %164 = dma.done.wait [#allocation5], 16  }
  0xc9   :  { %165 = vsyncadd [#allocation5], 4294967280 }
  0xca   :  { %89 = sfence }
  0xcb   :  { %90 = vsyncpa [#allocation4], 1 }
  0xcc   :  { %91 = vsyncpa [#allocation7], 1 }
  0xcd   :  { %92 = vsyncpa [#allocation5], 1 }

</bundles_post_ra>
